<compile_context>
chip_gen: v5e
topology: v5e:2x2
jax: 0.10.0
libtpu: 0.0.40
codegen_flags: <defaults>
</compile_context>

<pallas_src>
import math
import jax
import jax.numpy as jnp
from jax.experimental import pallas as pl
from jax.experimental.pallas import tpu as pltpu

LANE = 128
_NEG_BIG = -1e30


def _round_up(v, m):
    return ((v + m - 1) // m) * m


def _pad2(a, rows, cols):
    r, c = a.shape
    return jnp.pad(a, ((0, rows - r), (0, cols - c)))


# ---------------------------------------------------------------------------
# Fused Pallas kernel: all GCN layers + log_softmax in one pallas_call.
# ---------------------------------------------------------------------------

def _make_fused_gcn_kernel(num_layers, valid_out_cols, transform_first):
    """kernel(adj, x, w0, b0, ..., w_{L-1}, b_{L-1}, out).

    `transform_first[li]` (Python bool, trace-time) picks the cheaper matmul
    order for layer li on the padded shapes.
    """

    def kernel(*refs):
        adj_ref, x_ref = refs[0], refs[1]
        o_ref = refs[-1]
        wb = refs[2:-1]

        adj = adj_ref[...]                              # bf16 (Np, Np)
        h = x_ref[...]                                  # bf16 (Np, PFin)

        def gcn_layer(h_in, li):
            w = wb[2 * li][...]                         # bf16 (PFi, PFo)
            b = wb[2 * li + 1][...]                     # f32  (1, PFo)
            if transform_first[li]:
                hw = jnp.dot(h_in, w, preferred_element_type=jnp.float32)
                out = jnp.dot(adj, hw.astype(jnp.bfloat16),
                              preferred_element_type=jnp.float32)
            else:
                ah = jnp.dot(adj, h_in, preferred_element_type=jnp.float32)
                out = jnp.dot(ah.astype(jnp.bfloat16), w,
                              preferred_element_type=jnp.float32)
            return out + b

        # Hidden layers: GCNConv -> (folded BN) -> ReLU.  Dropout is identity
        # in eval mode.
        for li in range(num_layers - 1):
            h32 = gcn_layer(h, li)
            h = jnp.maximum(h32, 0.0).astype(jnp.bfloat16)

        # Final layer + log_softmax masked to the real (unpadded) classes.
        logits = gcn_layer(h, num_layers - 1)
        col = jax.lax.broadcasted_iota(jnp.int32, logits.shape, 1)
        valid = col < valid_out_cols
        logits = jnp.where(valid, logits, _NEG_BIG)
        m = jnp.max(logits, axis=-1, keepdims=True)
        z = logits - m
        lse = jnp.log(jnp.sum(jnp.where(valid, jnp.exp(z), 0.0),
                              axis=-1, keepdims=True))
        o_ref[...] = z - lse

    return kernel


def _full_spec(shape):
    # Single-block (full-array) spec: block == array shape.
    return pl.BlockSpec(shape, lambda i: tuple(0 for _ in shape))


def _fold_bn(w, b, gamma, beta, rmean, rvar, eps=1e-5):
    """Fold eval-mode BatchNorm1d into the preceding conv's W/b (exact)."""
    scale = gamma * jax.lax.rsqrt(rvar + eps)           # (1, f_out)
    return w * scale, (b - rmean) * scale + beta


@jax.jit
def gcn_forward(x, adj_norm, convs, bns):
    num_layers = len(convs)
    n, f_in = x.shape
    out_c = convs[-1][0].shape[1]

    # 1. Fold BN into hidden-layer weights/bias.
    layers = []
    for li in range(num_layers - 1):
        w, b = convs[li]
        layers.append(_fold_bn(w, b, *bns[li]))
    layers.append(convs[-1])

    # 2. Pad node/feature dims to 128 lanes and cast matmul operands to bf16.
    #    Padded adjacency rows/cols and x rows are zero, so valid rows are
    #    unaffected; padded class columns are masked in the kernel.
    n_pad = _round_up(n, LANE)
    pdim = lambda d: _round_up(d, LANE)

    adj_p = _pad2(adj_norm, n_pad, n_pad).astype(jnp.bfloat16)
    x_p = _pad2(x, n_pad, pdim(f_in)).astype(jnp.bfloat16)

    args = [adj_p, x_p]
    transform_first = []
    flops = 0
    for w, b in layers:
        fi, fo = w.shape
        fi_p, fo_p = pdim(fi), pdim(fo)
        args.append(_pad2(w, fi_p, fo_p).astype(jnp.bfloat16))
        args.append(_pad2(b, 1, fo_p).astype(jnp.float32))
        # Choose the matmul order that minimizes MXU work on padded shapes:
        #   transform-first  : Np*Fi*Fo + Np*Np*Fo
        #   aggregate-first  : Np*Np*Fi + Np*Fi*Fo
        tf = fo_p <= fi_p
        transform_first.append(tf)
        if tf:
            flops += 2 * (n_pad * fi_p * fo_p + n_pad * n_pad * fo_p)
        else:
            flops += 2 * (n_pad * n_pad * fi_p + n_pad * fi_p * fo_p)

    out_pad = pdim(out_c)
    bytes_accessed = sum(int(a.size) * a.dtype.itemsize for a in args)
    bytes_accessed += n_pad * out_pad * 4

    # TODO(synk): for large N (adj no longer VMEM-resident), switch to a
    # row-tiled "parallel" grid over nodes with per-layer pallas_calls (or a
    # K-chunked accumulator) instead of one fully-fused block.
    kernel = _make_fused_gcn_kernel(num_layers, out_c, tuple(transform_first))
    out = pl.pallas_call(
        kernel,
        out_shape=jax.ShapeDtypeStruct((n_pad, out_pad), jnp.float32),
        grid=(1,),
        in_specs=[_full_spec(a.shape) for a in args],
        out_specs=_full_spec((n_pad, out_pad)),
        compiler_params=pltpu.CompilerParams(
            dimension_semantics=("arbitrary",),
            vmem_limit_bytes=64 << 20),
        cost_estimate=pl.CostEstimate(
            flops=flops,
            transcendentals=n_pad * out_pad,
            bytes_accessed=bytes_accessed),
    )(*args)
    return out[:n, :out_c]


# ---------------------------------------------------------------------------
# Parameter init (deterministic, mirrors module __init__ shapes) + glue
# ---------------------------------------------------------------------------

def glorot(key, fan_in, fan_out):
    limit = math.sqrt(6.0 / (fan_in + fan_out))
    return jax.random.uniform(key, (fan_in, fan_out), jnp.float32, -limit, limit)


def init_gcn_params(key, in_channels, hidden_channels, out_channels, num_layers):
    dims = [in_channels] + [hidden_channels] * (num_layers - 1) + [out_channels]
    convs, bns = [], []
    for li in range(num_layers):
        key, kw, kg, kb, km, kv = jax.random.split(key, 6)
        w = glorot(kw, dims[li], dims[li + 1])
        b = jnp.zeros((1, dims[li + 1]), jnp.float32)
        convs.append((w, b))
        if li < num_layers - 1:
            f = dims[li + 1]
            # Deterministic non-trivial BN params (synthetic eval-mode stats).
            gamma = 1.0 + 0.1 * jax.random.normal(kg, (1, f), jnp.float32)
            beta = 0.1 * jax.random.normal(kb, (1, f), jnp.float32)
            rmean = 0.05 * jax.random.normal(km, (1, f), jnp.float32)
            rvar = 1.0 + 0.1 * jax.random.uniform(kv, (1, f), jnp.float32)
            bns.append((gamma, beta, rmean, rvar))
    return convs, bns


def gcn_normalize_adj(adj):
    """gcn_norm with self-loops: D^{-1/2} (A + I) D^{-1/2} (plain-JAX glue)."""
    n = adj.shape[0]
    a_hat = adj + jnp.eye(n, dtype=adj.dtype)
    deg = jnp.sum(a_hat, axis=1)
    d_inv_sqrt = jnp.where(deg > 0, jax.lax.rsqrt(deg), 0.0)
    return a_hat * d_inv_sqrt[:, None] * d_inv_sqrt[None, :]


# ---------------------------------------------------------------------------
# Main
# ---------------------------------------------------------------------------

if __name__ == "__main__":
    N = 64                 # number of graph nodes
    IN_C, HID_C, OUT_C = 32, 32, 16
    NUM_LAYERS = 3
    DROPOUT = 0.5          # inactive in eval mode

    key = jax.random.PRNGKey(0)
    k_feat, k_adj, k_par = jax.random.split(key, 3)

    # Node features [N, IN_C]
    x = jax.random.normal(k_feat, (N, IN_C), jnp.float32)

    # Random symmetric binary adjacency, then GCN-normalized.
    a_rand = jax.random.uniform(k_adj, (N, N), jnp.float32)
    a_bin = (a_rand < 0.1).astype(jnp.float32)
    adj = jnp.maximum(a_bin, a_bin.T) * (1.0 - jnp.eye(N, dtype=jnp.float32))
    adj_norm = gcn_normalize_adj(adj)

    convs, bns = init_gcn_params(k_par, IN_C, HID_C, OUT_C, NUM_LAYERS)

    out = gcn_forward(x, adj_norm, convs, bns)
    out = jax.block_until_ready(out)

    # Sanity: log-softmax rows should sum to ~1 in prob space.
    assert out.shape == (N, OUT_C)
    row_sums = jnp.sum(jnp.exp(out), axis=-1)
    assert bool(jnp.all(jnp.abs(row_sums - 1.0) < 1e-4))

    print("KERNEL_OK")
</pallas_src>

<mosaic_0001>
module attributes {stable_mosaic.version = 11 : i64} {
  func.func @kernel(%arg0: i32, %arg1: memref<128x128xbf16, #tpu.memory_space<vmem>>, %arg2: memref<128x128xbf16, #tpu.memory_space<vmem>>, %arg3: memref<128x128xbf16, #tpu.memory_space<vmem>>, %arg4: memref<1x128xf32, #tpu.memory_space<vmem>>, %arg5: memref<128x128xbf16, #tpu.memory_space<vmem>>, %arg6: memref<1x128xf32, #tpu.memory_space<vmem>>, %arg7: memref<128x128xbf16, #tpu.memory_space<vmem>>, %arg8: memref<1x128xf32, #tpu.memory_space<vmem>>, %arg9: memref<128x128xf32, #tpu.memory_space<vmem>>) attributes {dimension_semantics = [#tpu.dimension_semantics<arbitrary>], iteration_bounds = array<i64: 1>, scalar_prefetch = 0 : i64, scratch_operands = 0 : i64, tpu.core_type = #tpu.core_type<tc>, window_params = [{pipeline_mode = #tpu.pipeline_mode<synchronous>, transform_indices = @transform_0, window_bounds = array<i64: 128, 128>}, {pipeline_mode = #tpu.pipeline_mode<synchronous>, transform_indices = @transform_1, window_bounds = array<i64: 128, 128>}, {pipeline_mode = #tpu.pipeline_mode<synchronous>, transform_indices = @transform_2, window_bounds = array<i64: 128, 128>}, {pipeline_mode = #tpu.pipeline_mode<synchronous>, transform_indices = @transform_3, window_bounds = array<i64: 1, 128>}, {pipeline_mode = #tpu.pipeline_mode<synchronous>, transform_indices = @transform_4, window_bounds = array<i64: 128, 128>}, {pipeline_mode = #tpu.pipeline_mode<synchronous>, transform_indices = @transform_5, window_bounds = array<i64: 1, 128>}, {pipeline_mode = #tpu.pipeline_mode<synchronous>, transform_indices = @transform_6, window_bounds = array<i64: 128, 128>}, {pipeline_mode = #tpu.pipeline_mode<synchronous>, transform_indices = @transform_7, window_bounds = array<i64: 1, 128>}, {pipeline_mode = #tpu.pipeline_mode<synchronous>, transform_indices = @transform_8, window_bounds = array<i64: 128, 128>}]} {
    %c0 = arith.constant 0 : index
    %c0_0 = arith.constant 0 : index
    %0 = vector.load %arg1[%c0, %c0_0] : memref<128x128xbf16, #tpu.memory_space<vmem>>, vector<128x128xbf16>
    %c0_1 = arith.constant 0 : index
    %c0_2 = arith.constant 0 : index
    %1 = vector.load %arg2[%c0_1, %c0_2] : memref<128x128xbf16, #tpu.memory_space<vmem>>, vector<128x128xbf16>
    %c0_3 = arith.constant 0 : index
    %c0_4 = arith.constant 0 : index
    %2 = vector.load %arg3[%c0_3, %c0_4] : memref<128x128xbf16, #tpu.memory_space<vmem>>, vector<128x128xbf16>
    %c0_5 = arith.constant 0 : index
    %c0_6 = arith.constant 0 : index
    %3 = vector.load %arg4[%c0_5, %c0_6] : memref<1x128xf32, #tpu.memory_space<vmem>>, vector<1x128xf32>
    %cst = arith.constant dense<0.000000e+00> : vector<128x128xf32>
    %4 = tpu.matmul %1, %2, %cst {dimension_numbers = #tpu.dot_dimension_numbers<[1], [0], [0], [1], [0, 0, 1, 1], [], []>} : vector<128x128xbf16>, vector<128x128xbf16>, vector<128x128xf32> -> vector<128x128xf32>
    %5 = arith.truncf %4 : vector<128x128xf32> to vector<128x128xbf16>
    %cst_7 = arith.constant dense<0.000000e+00> : vector<128x128xf32>
    %6 = tpu.matmul %0, %5, %cst_7 {dimension_numbers = #tpu.dot_dimension_numbers<[1], [0], [0], [1], [0, 0, 1, 1], [], []>} : vector<128x128xbf16>, vector<128x128xbf16>, vector<128x128xf32> -> vector<128x128xf32>
    %7 = vector.broadcast %3 : vector<1x128xf32> to vector<128x128xf32>
    %8 = arith.addf %6, %7 : vector<128x128xf32>
    %cst_8 = arith.constant 0.000000e+00 : f32
    %9 = vector.broadcast %cst_8 : f32 to vector<128x128xf32>
    %10 = arith.maximumf %8, %9 : vector<128x128xf32>
    %11 = arith.truncf %10 : vector<128x128xf32> to vector<128x128xbf16>
    %c0_9 = arith.constant 0 : index
    %c0_10 = arith.constant 0 : index
    %12 = vector.load %arg5[%c0_9, %c0_10] : memref<128x128xbf16, #tpu.memory_space<vmem>>, vector<128x128xbf16>
    %c0_11 = arith.constant 0 : index
    %c0_12 = arith.constant 0 : index
    %13 = vector.load %arg6[%c0_11, %c0_12] : memref<1x128xf32, #tpu.memory_space<vmem>>, vector<1x128xf32>
    %cst_13 = arith.constant dense<0.000000e+00> : vector<128x128xf32>
    %14 = tpu.matmul %11, %12, %cst_13 {dimension_numbers = #tpu.dot_dimension_numbers<[1], [0], [0], [1], [0, 0, 1, 1], [], []>} : vector<128x128xbf16>, vector<128x128xbf16>, vector<128x128xf32> -> vector<128x128xf32>
    %15 = arith.truncf %14 : vector<128x128xf32> to vector<128x128xbf16>
    %cst_14 = arith.constant dense<0.000000e+00> : vector<128x128xf32>
    %16 = tpu.matmul %0, %15, %cst_14 {dimension_numbers = #tpu.dot_dimension_numbers<[1], [0], [0], [1], [0, 0, 1, 1], [], []>} : vector<128x128xbf16>, vector<128x128xbf16>, vector<128x128xf32> -> vector<128x128xf32>
    %17 = vector.broadcast %13 : vector<1x128xf32> to vector<128x128xf32>
    %18 = arith.addf %16, %17 : vector<128x128xf32>
    %cst_15 = arith.constant 0.000000e+00 : f32
    %19 = vector.broadcast %cst_15 : f32 to vector<128x128xf32>
    %20 = arith.maximumf %18, %19 : vector<128x128xf32>
    %21 = arith.truncf %20 : vector<128x128xf32> to vector<128x128xbf16>
    %c0_16 = arith.constant 0 : index
    %c0_17 = arith.constant 0 : index
    %22 = vector.load %arg7[%c0_16, %c0_17] : memref<128x128xbf16, #tpu.memory_space<vmem>>, vector<128x128xbf16>
    %c0_18 = arith.constant 0 : index
    %c0_19 = arith.constant 0 : index
    %23 = vector.load %arg8[%c0_18, %c0_19] : memref<1x128xf32, #tpu.memory_space<vmem>>, vector<1x128xf32>
    %cst_20 = arith.constant dense<0.000000e+00> : vector<128x128xf32>
    %24 = tpu.matmul %21, %22, %cst_20 {dimension_numbers = #tpu.dot_dimension_numbers<[1], [0], [0], [1], [0, 0, 1, 1], [], []>} : vector<128x128xbf16>, vector<128x128xbf16>, vector<128x128xf32> -> vector<128x128xf32>
    %25 = arith.truncf %24 : vector<128x128xf32> to vector<128x128xbf16>
    %cst_21 = arith.constant dense<0.000000e+00> : vector<128x128xf32>
    %26 = tpu.matmul %0, %25, %cst_21 {dimension_numbers = #tpu.dot_dimension_numbers<[1], [0], [0], [1], [0, 0, 1, 1], [], []>} : vector<128x128xbf16>, vector<128x128xbf16>, vector<128x128xf32> -> vector<128x128xf32>
    %27 = vector.broadcast %23 : vector<1x128xf32> to vector<128x128xf32>
    %28 = arith.addf %26, %27 : vector<128x128xf32>
    %29 = tpu.iota {dimensions = array<i32: 1>} : vector<128x128xi32>
    %c16_i32 = arith.constant 16 : i32
    %30 = vector.broadcast %c16_i32 : i32 to vector<128x128xi32>
    %31 = arith.cmpi slt, %29, %30 : vector<128x128xi32>
    %cst_22 = arith.constant -1.000000e+30 : f32
    %32 = vector.broadcast %cst_22 : f32 to vector<128x128xf32>
    %33 = arith.select %31, %28, %32 : vector<128x128xi1>, vector<128x128xf32>
    %cst_23 = arith.constant dense<0xFF800000> : vector<128xf32>
    %34 = vector.multi_reduction <maximumf>, %33, %cst_23 [1] : vector<128x128xf32> to vector<128xf32>
    %35 = vector.shape_cast %34 : vector<128xf32> to vector<128x1xf32>
    %36 = vector.broadcast %35 : vector<128x1xf32> to vector<128x128xf32>
    %37 = arith.subf %33, %36 : vector<128x128xf32>
    %38 = math.exp %37 : vector<128x128xf32>
    %cst_24 = arith.constant 0.000000e+00 : f32
    %39 = vector.broadcast %cst_24 : f32 to vector<128x128xf32>
    %40 = arith.select %31, %38, %39 : vector<128x128xi1>, vector<128x128xf32>
    %cst_25 = arith.constant dense<0.000000e+00> : vector<128xf32>
    %41 = vector.multi_reduction <add>, %40, %cst_25 [1] : vector<128x128xf32> to vector<128xf32>
    %42 = vector.shape_cast %41 : vector<128xf32> to vector<128x1xf32>
    %43 = math.log %42 : vector<128x1xf32>
    %44 = vector.broadcast %43 : vector<128x1xf32> to vector<128x128xf32>
    %45 = arith.subf %37, %44 : vector<128x128xf32>
    %c0_26 = arith.constant 0 : index
    %c0_27 = arith.constant 0 : index
    %46 = vector.load %arg9[%c0_26, %c0_27] : memref<128x128xf32, #tpu.memory_space<vmem>>, vector<128x128xf32>
    tpu.vector_store %arg9[%c0_26, %c0_27], %45 {strides = array<i32>} : memref<128x128xf32, #tpu.memory_space<vmem>>, vector<128x128xf32>,
    return
  }
  func.func @transform_0(%arg0: i32) -> (i32, i32) {
    %c0_i32 = arith.constant 0 : i32
    %c0_i32_0 = arith.constant 0 : i32
    %c0_i32_1 = arith.constant 0 : i32
    return %c0_i32, %c0_i32_0 : i32, i32
  }
  func.func @transform_1(%arg0: i32) -> (i32, i32) {
    %c0_i32 = arith.constant 0 : i32
    %c0_i32_0 = arith.constant 0 : i32
    %c0_i32_1 = arith.constant 0 : i32
    return %c0_i32, %c0_i32_0 : i32, i32
  }
  func.func @transform_2(%arg0: i32) -> (i32, i32) {
    %c0_i32 = arith.constant 0 : i32
    %c0_i32_0 = arith.constant 0 : i32
    %c0_i32_1 = arith.constant 0 : i32
    return %c0_i32, %c0_i32_0 : i32, i32
  }
  func.func @transform_3(%arg0: i32) -> (i32, i32) {
    %c0_i32 = arith.constant 0 : i32
    %c0_i32_0 = arith.constant 0 : i32
    %c0_i32_1 = arith.constant 0 : i32
    return %c0_i32, %c0_i32_0 : i32, i32
  }
  func.func @transform_4(%arg0: i32) -> (i32, i32) {
    %c0_i32 = arith.constant 0 : i32
    %c0_i32_0 = arith.constant 0 : i32
    %c0_i32_1 = arith.constant 0 : i32
    return %c0_i32, %c0_i32_0 : i32, i32
  }
  func.func @transform_5(%arg0: i32) -> (i32, i32) {
    %c0_i32 = arith.constant 0 : i32
    %c0_i32_0 = arith.constant 0 : i32
    %c0_i32_1 = arith.constant 0 : i32
    return %c0_i32, %c0_i32_0 : i32, i32
  }
  func.func @transform_6(%arg0: i32) -> (i32, i32) {
    %c0_i32 = arith.constant 0 : i32
    %c0_i32_0 = arith.constant 0 : i32
    %c0_i32_1 = arith.constant 0 : i32
    return %c0_i32, %c0_i32_0 : i32, i32
  }
  func.func @transform_7(%arg0: i32) -> (i32, i32) {
    %c0_i32 = arith.constant 0 : i32
    %c0_i32_0 = arith.constant 0 : i32
    %c0_i32_1 = arith.constant 0 : i32
    return %c0_i32, %c0_i32_0 : i32, i32
  }
  func.func @transform_8(%arg0: i32) -> (i32, i32) {
    %c0_i32 = arith.constant 0 : i32
    %c0_i32_0 = arith.constant 0 : i32
    %c0_i32_1 = arith.constant 0 : i32
    return %c0_i32, %c0_i32_0 : i32, i32
  }
}

</mosaic_0001>

<bundles_post_ra>
// kernel: gcn_forward.1
= control target key start
LH: loop header
LB: loop body
LE: loop exit
PB: predicated region body
PF: predicated region fallthrough
CT: control target
= control target key end

     0   :  { %s1696_s2 = inlined_call_operand.vmem [shape: bf16[128,128], index: 2, kind: input, shape index: {}]   ;;  %s1697_s1 = inlined_call_operand.vmem [shape: bf16[128,128], index: 1, kind: input, shape index: {}]   ;;  %s1698_s3 = inlined_call_operand.vmem [shape: f32[1,128], index: 3, kind: input, shape index: {}]   ;;  %s1699_s0 = inlined_call_operand.vmem [shape: bf16[128,128], index: 0, kind: input, shape index: {}]   ;;  %s1700_s4 = inlined_call_operand.vmem [shape: bf16[128,128], index: 4, kind: input, shape index: {}]   ;;  %s1701_s5 = inlined_call_operand.vmem [shape: f32[1,128], index: 5, kind: input, shape index: {}]   ;;  %s1702_s6 = inlined_call_operand.vmem [shape: bf16[128,128], index: 6, kind: input, shape index: {}]   ;;  %s1703_s7 = inlined_call_operand.vmem [shape: f32[1,128], index: 7, kind: input, shape index: {}]   ;;  %s1704_s8 = inlined_call_operand.vmem [shape: f32[128,128], index: 8, kind: output, shape index: {}]  }
   0x1   :  { %v1125_v0 = vld [vmem:[%s1696_s2 + $0x38] sm:$0xff]  ;;  %v1124_v1 = vld [vmem:[%s1696_s2 + $0x30] sm:$0xff]  ;;  %v1123_v2 = vld [vmem:[%s1696_s2 + $0x28] sm:$0xff] }
   0x2   :  { %1142 = vmatpush.bf16.msra.mxu2 %v1125_v0  ;;  %174 = vmatpush.bf16.msra.mxu0 %v1125_v0  ;;  %v1122_v3 = vld [vmem:[%s1696_s2 + $0x20] sm:$0xff]  ;;  %v1121_v4 = vld [vmem:[%s1696_s2 + $0x18] sm:$0xff]  ;;  %v1120_v5 = vld [vmem:[%s1696_s2 + $0x10] sm:$0xff] }
   0x3   :  { %v1119_v6 = vld [vmem:[%s1696_s2 + $0x8] sm:$0xff]  ;;  %v1118_v7 = vld [vmem:[%s1696_s2] sm:$0xff]  ;;  %v1116_v12 = vld [vmem:[%s1697_s1 + $0x30] sm:$0xff] }
   0x4   :  { %v1114_v8 = vld [vmem:[%s1697_s1 + $0x20] sm:$0xff]  ;;  %v1115_v10 = vld [vmem:[%s1697_s1 + $0x28] sm:$0xff]  ;;  %v1112_v13 = vld [vmem:[%s1697_s1 + $0x10] sm:$0xff] }
   0x5   :  { %v1110_v9 = vld [vmem:[%s1697_s1] sm:$0xff]  ;;  %v1111_v11 = vld [vmem:[%s1697_s1 + $0x8] sm:$0xff]  ;;  %v1117_v14 = vld [vmem:[%s1697_s1 + $0x38] sm:$0xff] }
   0x6   :  { %1143 = vmatpush.bf16.msra.mxu2 %v1124_v1  ;;  %175 = vmatpush.bf16.msra.mxu0 %v1124_v1  ;;  %v1113_v15 = vld [vmem:[%s1697_s1 + $0x18] sm:$0xff]  ;;  %v1321_v40 = vld [vmem:[%s1699_s0] sm:$0xff]  ;;  %v1327_v41 = vld [vmem:[%s1699_s0 + $0x8] sm:$0xff] }
   0x7   :  { %v1333_v42 = vld [vmem:[%s1699_s0 + $0x20] sm:$0xff]  ;;  %v1339_v43 = vld [vmem:[%s1699_s0 + $0x10] sm:$0xff]  ;;  %v1344_v44 = vld [vmem:[%s1699_s0 + $0x28] sm:$0xff] }
   0x8   :  { %v1133_v45 = vld [vmem:[%s1700_s4 + $0x38] sm:$0xff]  ;;  %v1132_v46 = vld [vmem:[%s1700_s4 + $0x30] sm:$0xff]  ;;  %v1131_v47 = vld [vmem:[%s1700_s4 + $0x28] sm:$0xff] }
   0x9   :  { %v1360_v48 = vld [vmem:[%s1699_s0 + $0x18] sm:$0xff]  ;;  %v1130_v49 = vld [vmem:[%s1700_s4 + $0x20] sm:$0xff]  ;;  %v1368_v50 = vld [vmem:[%s1699_s0 + $0x30] sm:$0xff] }
   0xa   :  { %1144 = vmatpush.bf16.msra.mxu2 %v1123_v2  ;;  %176 = vmatpush.bf16.msra.mxu0 %v1123_v2  ;;  %v1375_v51 = vld [vmem:[%s1699_s0 + $0x38] sm:$0xff]  ;;  %v1128_v53 = vld [vmem:[%s1700_s4 + $0x10] sm:$0xff]  ;;  %v1127_v54 = vld [vmem:[%s1700_s4 + $0x8] sm:$0xff] }
   0xb   :  { %v1129_v52 = vld [vmem:[%s1700_s4 + $0x18] sm:$0xff]  ;;  %v1126_v55 = vld [vmem:[%s1700_s4] sm:$0xff] }
   0xc   :  { %v1158_v57 = vld [vmem:[%s1698_s3] ss:$0 sm:$0xff] }
   0xe   :  { %1145 = vmatpush.bf16.msra.mxu2 %v1122_v3  ;;  %177 = vmatpush.bf16.msra.mxu0 %v1122_v3 }
  0x12   :  { %1146 = vmatpush.bf16.msra.mxu2 %v1121_v4  ;;  %178 = vmatpush.bf16.msra.mxu0 %v1121_v4 }
  0x16   :  { %1147 = vmatpush.bf16.msra.mxu2 %v1120_v5  ;;  %179 = vmatpush.bf16.msra.mxu0 %v1120_v5 }
  0x1a   :  { %1148 = vmatpush.bf16.msra.mxu2 %v1119_v6  ;;  %180 = vmatpush.bf16.msra.mxu0 %v1119_v6 }
  0x1e   :  { %1149 = vmatpush.bf16.msra.mxu2 %v1118_v7  ;;  %181 = vmatpush.bf16.msra.mxu0 %v1118_v7 }
  0x21   :  { %202 = vmatmul.bf16.vlgmr.msra.gmra.mxu2 %v1114_v8  ;;  %182 = vmatmul.bf16.vlgmr.msra.gmra.mxu0 %v1110_v9 }
  0x22   :  { %420 = vmatpush.bf16.msrb.mxu2 %v1133_v45 }
  0x26   :  { %421 = vmatpush.bf16.msrb.mxu2 %v1132_v46 }
  0x2a   :  { %422 = vmatpush.bf16.msrb.mxu2 %v1131_v47 }
  0x2e   :  { %423 = vmatpush.bf16.msrb.mxu2 %v1130_v49 }
  0x31   :  { %207 = vmatmul.bf16.gmra.mxu2 %v1115_v10  ;;  %187 = vmatmul.bf16.gmra.mxu0 %v1111_v11 }
  0x32   :  { %424 = vmatpush.bf16.msrb.mxu2 %v1129_v52 }
  0x36   :  { %425 = vmatpush.bf16.msrb.mxu2 %v1128_v53 }
  0x3a   :  { %426 = vmatpush.bf16.msrb.mxu2 %v1127_v54 }
  0x3e   :  { %427 = vmatpush.bf16.msrb.mxu2 %v1126_v55 }
  0x41   :  { %212 = vmatmul.bf16.gmra.mxu2 %v1116_v12  ;;  %192 = vmatmul.bf16.gmra.mxu0 %v1112_v13 }
  0x51   :  { %217 = vmatmul.bf16.gmra.mxu2 %v1117_v14  ;;  %197 = vmatmul.bf16.gmra.mxu0 %v1113_v15 }
  0x9e   :  { %v183_v17 = vpop.f32.mrf.mxu0 }
  0xa4   :  { %v203_v16 = vpop.f32.mrf.mxu2 }
  0xa6   :  { %v185_v19 = vpop.f32.mrf.mxu0 }
  0xa7   :  { %v223_v39 = vpack.c.bf16 %v185_v19, %v183_v17 }
  0xac   :  { %v205_v18 = vpop.f32.mrf.mxu2 }
  0xad   :  { %v227_v34 = vpack.c.bf16 %v205_v18, %v203_v16 }
  0xae   :  { %v188_v21 = vpop.f32.mrf.mxu0 }
  0xb4   :  { %v208_v20 = vpop.f32.mrf.mxu2 }
  0xb6   :  { %v190_v23 = vpop.f32.mrf.mxu0 }
  0xb7   :  { %v224_v38 = vpack.c.bf16 %v190_v23, %v188_v21 }
  0xbc   :  { %v210_v22 = vpop.f32.mrf.mxu2 }
  0xbd   :  { %v228_v33 = vpack.c.bf16 %v210_v22, %v208_v20 }
  0xbe   :  { %v193_v25 = vpop.f32.mrf.mxu0 }
  0xc4   :  { %v213_v24 = vpop.f32.mrf.mxu2 }
  0xc6   :  { %v195_v28 = vpop.f32.mrf.mxu0 }
  0xc7   :  { %v225_v37 = vpack.c.bf16 %v195_v28, %v193_v25 }
  0xcc   :  { %v215_v26 = vpop.f32.mrf.mxu2 }
  0xcd   :  { %v229_v32 = vpack.c.bf16 %v215_v26, %v213_v24 }
  0xce   :  { %v198_v31 = vpop.f32.mrf.mxu0 }
  0xd4   :  { %v218_v27 = vpop.f32.mrf.mxu2 }
  0xd6   :  { %v200_v35 = vpop.f32.mrf.mxu0 }
  0xd7   :  { %v226_v36 = vpack.c.bf16 %v200_v35, %v198_v31 }
  0xdc   :  { %v220_v29 = vpop.f32.mrf.mxu2 }
  0xdd   :  { %v230_v30 = vpack.c.bf16 %v220_v29, %v218_v27 }
  0xdf   :  { %282 = vmatpush.bf16.msra.mxu1 %v230_v30  ;;  %1150 = vmatpush.bf16.msra.mxu3 %v230_v30 }
  0xe3   :  { %283 = vmatpush.bf16.msra.mxu1 %v229_v32  ;;  %1151 = vmatpush.bf16.msra.mxu3 %v229_v32 }
  0xe7   :  { %284 = vmatpush.bf16.msra.mxu1 %v228_v33  ;;  %1152 = vmatpush.bf16.msra.mxu3 %v228_v33 }
  0xeb   :  { %285 = vmatpush.bf16.msra.mxu1 %v227_v34  ;;  %1153 = vmatpush.bf16.msra.mxu3 %v227_v34 }
  0xef   :  { %286 = vmatpush.bf16.msra.mxu1 %v226_v36  ;;  %1154 = vmatpush.bf16.msra.mxu3 %v226_v36 }
  0xf3   :  { %287 = vmatpush.bf16.msra.mxu1 %v225_v37  ;;  %1155 = vmatpush.bf16.msra.mxu3 %v225_v37 }
  0xf7   :  { %288 = vmatpush.bf16.msra.mxu1 %v224_v38  ;;  %1156 = vmatpush.bf16.msra.mxu3 %v224_v38 }
  0xfb   :  { %289 = vmatpush.bf16.msra.mxu1 %v223_v39  ;;  %1157 = vmatpush.bf16.msra.mxu3 %v223_v39 }
  0xfe   :  { %290 = vmatmul.bf16.vlgmr.msra.gmra.mxu1 %v1321_v40  ;;  %310 = vmatmul.bf16.vlgmr.msra.gmra.mxu3 %v1333_v42 }
 0x10e   :  { %295 = vmatmul.bf16.gmra.mxu1 %v1327_v41  ;;  %315 = vmatmul.bf16.gmra.mxu3 %v1344_v44 }
 0x11e   :  { %300 = vmatmul.bf16.gmra.mxu1 %v1339_v43  ;;  %320 = vmatmul.bf16.gmra.mxu3 %v1368_v50 }
 0x12e   :  { %305 = vmatmul.bf16.gmra.mxu1 %v1360_v48  ;;  %325 = vmatmul.bf16.gmra.mxu3 %v1375_v51 }
 0x17b   :  { %v291_v56 = vpop.f32.mrf.mxu1 }
 0x17c   :  { %v292_v58 = vadd.f32 %v1158_v57, %v291_v56 }
 0x17e   :  { %v331_v61 = vmax.f32 %v292_v58, 0.0 }
 0x181   :  { %v311_v13 = vpop.f32.mrf.mxu3 }
 0x182   :  { %v312_v24 = vadd.f32 %v1158_v57, %v311_v13 }
 0x183   :  { %v293_v59 = vpop.f32.mrf.mxu1 }
 0x184   :  { %v294_v60 = vadd.f32 %v1158_v57, %v293_v59  ;;  %v339_v26 = vmax.f32 %v312_v24, 0.0  ;;  %v1134_v24 = vld [vmem:[%s1702_s6] sm:$0xff] }
 0x186   :  { %v332_v62 = vmax.f32 %v294_v60, 0.0 }
 0x188   :  { %v347_v63 = vpack.c.bf16 %v332_v62, %v331_v61 }
 0x189   :  { %v313_v16 = vpop.f32.mrf.mxu3 }
 0x18a   :  { %428 = vmatmul.bf16.vlgmr.msrb.gmra.mxu2 %v347_v63  ;;  %v314_v25 = vadd.f32 %v1158_v57, %v313_v16 }
 0x18b   :  { %v296_v0 = vpop.f32.mrf.mxu1 }
 0x18c   :  { %v297_v1 = vadd.f32 %v1158_v57, %v296_v0  ;;  %v340_v27 = vmax.f32 %v314_v25, 0.0 }
 0x18e   :  { %v333_v4 = vmax.f32 %v297_v1, 0.0  ;;  %v351_v29 = vpack.c.bf16 %v340_v27, %v339_v26  ;;  %v1159_v26 = vld [vmem:[%s1701_s5] ss:$0 sm:$0xff] }
 0x191   :  { %v316_v23 = vpop.f32.mrf.mxu3 }
 0x192   :  { %v317_v31 = vadd.f32 %v1158_v57, %v316_v23  ;;  %v1135_v23 = vld [vmem:[%s1702_s6 + $0x8] sm:$0xff] }
 0x193   :  { %v298_v2 = vpop.f32.mrf.mxu1 }
 0x194   :  { %v299_v3 = vadd.f32 %v1158_v57, %v298_v2  ;;  %v341_v33 = vmax.f32 %v317_v31, 0.0 }
 0x196   :  { %v334_v5 = vmax.f32 %v299_v3, 0.0 }
 0x198   :  { %v348_v6 = vpack.c.bf16 %v334_v5, %v333_v4 }
 0x199   :  { %v318_v28 = vpop.f32.mrf.mxu3 }
 0x19a   :  { %433 = vmatmul.bf16.gmra.mxu2 %v348_v6  ;;  %v319_v32 = vadd.f32 %v1158_v57, %v318_v28 }
 0x19b   :  { %v301_v7 = vpop.f32.mrf.mxu1 }
 0x19c   :  { %v302_v8 = vadd.f32 %v1158_v57, %v301_v7  ;;  %v342_v34 = vmax.f32 %v319_v32, 0.0 }
 0x19e   :  { %v335_v11 = vmax.f32 %v302_v8, 0.0  ;;  %v352_v35 = vpack.c.bf16 %v342_v34, %v341_v33 }
 0x1a1   :  { %v321_v30 = vpop.f32.mrf.mxu3 }
 0x1a2   :  { %v322_v37 = vadd.f32 %v1158_v57, %v321_v30 }
 0x1a3   :  { %v303_v9 = vpop.f32.mrf.mxu1 }
 0x1a4   :  { %v304_v10 = vadd.f32 %v1158_v57, %v303_v9  ;;  %v343_v45 = vmax.f32 %v322_v37, 0.0 }
 0x1a6   :  { %v336_v12 = vmax.f32 %v304_v10, 0.0 }
 0x1a8   :  { %v349_v14 = vpack.c.bf16 %v336_v12, %v335_v11 }
 0x1a9   :  { %v323_v36 = vpop.f32.mrf.mxu3 }
 0x1aa   :  { %438 = vmatmul.bf16.gmra.mxu2 %v349_v14  ;;  %v324_v38 = vadd.f32 %v1158_v57, %v323_v36 }
 0x1ab   :  { %v306_v15 = vpop.f32.mrf.mxu1 }
 0x1ac   :  { %v307_v17 = vadd.f32 %v1158_v57, %v306_v15  ;;  %v344_v46 = vmax.f32 %v324_v38, 0.0 }
 0x1ae   :  { %v337_v20 = vmax.f32 %v307_v17, 0.0  ;;  %v353_v47 = vpack.c.bf16 %v344_v46, %v343_v45  ;;  %v1141_v17 = vld [vmem:[%s1702_s6 + $0x38] sm:$0xff] }
 0x1af   :  { %618 = vmatpush.bf16.msrb.mxu0 %v1141_v17 }
 0x1b1   :  { %v326_v39 = vpop.f32.mrf.mxu3 }
 0x1b2   :  { %v327_v52 = vadd.f32 %v1158_v57, %v326_v39 }
 0x1b3   :  { %v308_v18 = vpop.f32.mrf.mxu1 }
 0x1b4   :  { %v309_v19 = vadd.f32 %v1158_v57, %v308_v18  ;;  %v345_v54 = vmax.f32 %v327_v52, 0.0  ;;  %v1140_v18 = vld [vmem:[%s1702_s6 + $0x30] sm:$0xff] }
 0x1b5   :  { %619 = vmatpush.bf16.msrb.mxu0 %v1140_v18 }
 0x1b6   :  { %v338_v21 = vmax.f32 %v309_v19, 0.0  ;;  %v1139_v19 = vld [vmem:[%s1702_s6 + $0x28] sm:$0xff] }
 0x1b8   :  { %v350_v22 = vpack.c.bf16 %v338_v21, %v337_v20  ;;  %v1138_v20 = vld [vmem:[%s1702_s6 + $0x20] sm:$0xff]  ;;  %v1137_v21 = vld [vmem:[%s1702_s6 + $0x18] sm:$0xff] }
 0x1b9   :  { %v328_v49 = vpop.f32.mrf.mxu3  ;;  %620 = vmatpush.bf16.msrb.mxu0 %v1139_v19 }
 0x1ba   :  { %443 = vmatmul.bf16.gmra.mxu2 %v350_v22  ;;  %v329_v53 = vadd.f32 %v1158_v57, %v328_v49  ;;  %v1136_v22 = vld [vmem:[%s1702_s6 + $0x10] sm:$0xff] }
 0x1bc   :  { %v346_v55 = vmax.f32 %v329_v53, 0.0 }
 0x1bd   :  { %621 = vmatpush.bf16.msrb.mxu0 %v1138_v20 }
 0x1be   :  { %v354_v56 = vpack.c.bf16 %v346_v55, %v345_v54 }
 0x1c1   :  { %622 = vmatpush.bf16.msrb.mxu0 %v1137_v21 }
 0x1c5   :  { %623 = vmatpush.bf16.msrb.mxu0 %v1136_v22 }
 0x1c9   :  { %624 = vmatpush.bf16.msrb.mxu0 %v1135_v23 }
 0x1ca   :  { %448 = vmatmul.bf16.gmra.mxu2 %v351_v29 }
 0x1cd   :  { %625 = vmatpush.bf16.msrb.mxu0 %v1134_v24 }
 0x1da   :  { %453 = vmatmul.bf16.gmra.mxu2 %v352_v35 }
 0x1ea   :  { %458 = vmatmul.bf16.gmra.mxu2 %v353_v47 }
 0x1fa   :  { %463 = vmatmul.bf16.gmra.mxu2 %v354_v56 }
 0x20d   :  { %v429_v58 = vpop.f32.mrf.mxu2 }
 0x215   :  { %v431_v59 = vpop.f32.mrf.mxu2 }
 0x216   :  { %v469_v60 = vpack.c.bf16 %v431_v59, %v429_v58 }
 0x21d   :  { %v434_v61 = vpop.f32.mrf.mxu2 }
 0x225   :  { %v436_v62 = vpop.f32.mrf.mxu2 }
 0x226   :  { %v470_v63 = vpack.c.bf16 %v436_v62, %v434_v61 }
 0x22d   :  { %v439_v0 = vpop.f32.mrf.mxu2 }
 0x235   :  { %v441_v1 = vpop.f32.mrf.mxu2 }
 0x236   :  { %v471_v2 = vpack.c.bf16 %v441_v1, %v439_v0 }
 0x23d   :  { %v444_v3 = vpop.f32.mrf.mxu2 }
 0x245   :  { %v446_v4 = vpop.f32.mrf.mxu2 }
 0x246   :  { %v472_v5 = vpack.c.bf16 %v446_v4, %v444_v3 }
 0x24d   :  { %v449_v6 = vpop.f32.mrf.mxu2 }
 0x255   :  { %v451_v7 = vpop.f32.mrf.mxu2 }
 0x256   :  { %v473_v16 = vpack.c.bf16 %v451_v7, %v449_v6 }
 0x25d   :  { %v454_v8 = vpop.f32.mrf.mxu2 }
 0x265   :  { %v456_v57 = vpop.f32.mrf.mxu2 }
 0x266   :  { %v474_v15 = vpack.c.bf16 %v456_v57, %v454_v8 }
 0x26d   :  { %v459_v9 = vpop.f32.mrf.mxu2 }
 0x275   :  { %v461_v10 = vpop.f32.mrf.mxu2 }
 0x276   :  { %v475_v14 = vpack.c.bf16 %v461_v10, %v459_v9 }
 0x27d   :  { %v464_v11 = vpop.f32.mrf.mxu2 }
 0x285   :  { %v466_v12 = vpop.f32.mrf.mxu2 }
 0x286   :  { %v476_v13 = vpack.c.bf16 %v466_v12, %v464_v11 }
 0x288   :  { %480 = vmatpush.bf16.msrb.mxu3 %v476_v13 }
 0x28c   :  { %481 = vmatpush.bf16.msrb.mxu3 %v475_v14 }
 0x290   :  { %482 = vmatpush.bf16.msrb.mxu3 %v474_v15 }
 0x294   :  { %483 = vmatpush.bf16.msrb.mxu3 %v473_v16 }
 0x298   :  { %484 = vmatpush.bf16.msrb.mxu3 %v472_v5 }
 0x29c   :  { %485 = vmatpush.bf16.msrb.mxu3 %v471_v2 }
 0x2a0   :  { %486 = vmatpush.bf16.msrb.mxu3 %v470_v63 }
 0x2a4   :  { %487 = vmatpush.bf16.msrb.mxu3 %v469_v60 }
 0x2a7   :  { %488 = vmatmul.bf16.vlgmr.msrb.gmra.mxu3 %v1321_v40 }
 0x2b7   :  { %493 = vmatmul.bf16.gmra.mxu3 %v1327_v41 }
 0x2c7   :  { %498 = vmatmul.bf16.gmra.mxu3 %v1339_v43 }
 0x2d7   :  { %503 = vmatmul.bf16.gmra.mxu3 %v1360_v48 }
 0x2e7   :  { %508 = vmatmul.bf16.gmra.mxu3 %v1333_v42 }
 0x2f7   :  { %513 = vmatmul.bf16.gmra.mxu3 %v1344_v44 }
 0x307   :  { %518 = vmatmul.bf16.gmra.mxu3 %v1368_v50 }
 0x317   :  { %523 = vmatmul.bf16.gmra.mxu3 %v1375_v51 }
 0x32a   :  { %v489_v25 = vpop.f32.mrf.mxu3 }
 0x32b   :  { %v490_v27 = vadd.f32 %v1159_v26, %v489_v25 }
 0x32d   :  { %v529_v30 = vmax.f32 %v490_v27, 0.0 }
 0x332   :  { %v491_v28 = vpop.f32.mrf.mxu3 }
 0x333   :  { %v492_v29 = vadd.f32 %v1159_v26, %v491_v28 }
 0x335   :  { %v530_v31 = vmax.f32 %v492_v29, 0.0 }
 0x337   :  { %v545_v32 = vpack.c.bf16 %v530_v31, %v529_v30 }
 0x339   :  { %626 = vmatmul.bf16.vlgmr.msrb.gmra.mxu0 %v545_v32 }
 0x33a   :  { %v494_v33 = vpop.f32.mrf.mxu3 }
 0x33b   :  { %v495_v34 = vadd.f32 %v1159_v26, %v494_v33 }
 0x33d   :  { %v531_v37 = vmax.f32 %v495_v34, 0.0 }
 0x342   :  { %v496_v35 = vpop.f32.mrf.mxu3 }
 0x343   :  { %v497_v36 = vadd.f32 %v1159_v26, %v496_v35 }
 0x345   :  { %v532_v38 = vmax.f32 %v497_v36, 0.0 }
 0x347   :  { %v546_v39 = vpack.c.bf16 %v532_v38, %v531_v37 }
 0x349   :  { %631 = vmatmul.bf16.gmra.mxu0 %v546_v39 }
 0x34a   :  { %v499_v45 = vpop.f32.mrf.mxu3 }
 0x34b   :  { %v500_v46 = vadd.f32 %v1159_v26, %v499_v45 }
 0x34d   :  { %v533_v52 = vmax.f32 %v500_v46, 0.0 }
 0x352   :  { %v501_v47 = vpop.f32.mrf.mxu3 }
 0x353   :  { %v502_v49 = vadd.f32 %v1159_v26, %v501_v47 }
 0x355   :  { %v534_v53 = vmax.f32 %v502_v49, 0.0 }
 0x357   :  { %v547_v54 = vpack.c.bf16 %v534_v53, %v533_v52 }
 0x359   :  { %636 = vmatmul.bf16.gmra.mxu0 %v547_v54 }
 0x35a   :  { %v504_v55 = vpop.f32.mrf.mxu3 }
 0x35b   :  { %v505_v56 = vadd.f32 %v1159_v26, %v504_v55 }
 0x35d   :  { %v535_v60 = vmax.f32 %v505_v56, 0.0 }
 0x362   :  { %v506_v58 = vpop.f32.mrf.mxu3 }
 0x363   :  { %v507_v59 = vadd.f32 %v1159_v26, %v506_v58 }
 0x365   :  { %v536_v61 = vmax.f32 %v507_v59, 0.0  ;;  %v727_v59 = vlaneseq }
 0x367   :  { %v548_v62 = vpack.c.bf16 %v536_v61, %v535_v60  ;;  %v1436_v60 = vand.u32 127, %v727_v59 }
 0x369   :  { %641 = vmatmul.bf16.gmra.mxu0 %v548_v62  ;;  %vm729_vm0 = vcmp.lt.s32.totalorder %v1436_v60, 16 }
 0x36a   :  { %v509_v63 = vpop.f32.mrf.mxu3 }
 0x36b   :  { %v510_v0 = vadd.f32 %v1159_v26, %v509_v63 }
 0x36d   :  { %v537_v3 = vmax.f32 %v510_v0, 0.0 }
 0x372   :  { %v511_v1 = vpop.f32.mrf.mxu3 }
 0x373   :  { %v512_v2 = vadd.f32 %v1159_v26, %v511_v1 }
 0x375   :  { %v538_v4 = vmax.f32 %v512_v2, 0.0 }
 0x377   :  { %v549_v5 = vpack.c.bf16 %v538_v4, %v537_v3 }
 0x379   :  { %646 = vmatmul.bf16.gmra.mxu0 %v549_v5 }
 0x37a   :  { %v514_v6 = vpop.f32.mrf.mxu3 }
 0x37b   :  { %v515_v7 = vadd.f32 %v1159_v26, %v514_v6 }
 0x37d   :  { %v539_v9 = vmax.f32 %v515_v7, 0.0 }
 0x382   :  { %v516_v8 = vpop.f32.mrf.mxu3 }
 0x383   :  { %v517_v57 = vadd.f32 %v1159_v26, %v516_v8 }
 0x385   :  { %v540_v10 = vmax.f32 %v517_v57, 0.0 }
 0x387   :  { %v550_v11 = vpack.c.bf16 %v540_v10, %v539_v9 }
 0x389   :  { %651 = vmatmul.bf16.gmra.mxu0 %v550_v11 }
 0x38a   :  { %v519_v12 = vpop.f32.mrf.mxu3 }
 0x38b   :  { %v520_v13 = vadd.f32 %v1159_v26, %v519_v12 }
 0x38d   :  { %v541_v16 = vmax.f32 %v520_v13, 0.0 }
 0x392   :  { %v521_v14 = vpop.f32.mrf.mxu3 }
 0x393   :  { %v522_v15 = vadd.f32 %v1159_v26, %v521_v14 }
 0x395   :  { %v542_v17 = vmax.f32 %v522_v15, 0.0 }
 0x397   :  { %v551_v18 = vpack.c.bf16 %v542_v17, %v541_v16 }
 0x399   :  { %656 = vmatmul.bf16.gmra.mxu0 %v551_v18 }
 0x39a   :  { %v524_v19 = vpop.f32.mrf.mxu3 }
 0x39b   :  { %v525_v20 = vadd.f32 %v1159_v26, %v524_v19 }
 0x39d   :  { %v543_v23 = vmax.f32 %v525_v20, 0.0 }
 0x3a2   :  { %v526_v21 = vpop.f32.mrf.mxu3 }
 0x3a3   :  { %v527_v22 = vadd.f32 %v1159_v26, %v526_v21 }
 0x3a5   :  { %v544_v24 = vmax.f32 %v527_v22, 0.0 }
 0x3a7   :  { %v552_v25 = vpack.c.bf16 %v544_v24, %v543_v23 }
 0x3a9   :  { %661 = vmatmul.bf16.gmra.mxu0 %v552_v25 }
 0x3b6   :  { %v627_v27 = vpop.f32.mrf.mxu0 }
 0x3be   :  { %v629_v28 = vpop.f32.mrf.mxu0 }
 0x3bf   :  { %v667_v29 = vpack.c.bf16 %v629_v28, %v627_v27 }
 0x3c6   :  { %v632_v30 = vpop.f32.mrf.mxu0 }
 0x3ce   :  { %v634_v31 = vpop.f32.mrf.mxu0 }
 0x3cf   :  { %v668_v32 = vpack.c.bf16 %v634_v31, %v632_v30 }
 0x3d6   :  { %v637_v33 = vpop.f32.mrf.mxu0 }
 0x3de   :  { %v639_v34 = vpop.f32.mrf.mxu0 }
 0x3df   :  { %v669_v35 = vpack.c.bf16 %v639_v34, %v637_v33 }
 0x3e6   :  { %v642_v36 = vpop.f32.mrf.mxu0 }
 0x3ee   :  { %v644_v37 = vpop.f32.mrf.mxu0 }
 0x3ef   :  { %v670_v38 = vpack.c.bf16 %v644_v37, %v642_v36 }
 0x3f6   :  { %v647_v39 = vpop.f32.mrf.mxu0 }
 0x3fe   :  { %v649_v45 = vpop.f32.mrf.mxu0 }
 0x3ff   :  { %v671_v58 = vpack.c.bf16 %v649_v45, %v647_v39 }
 0x406   :  { %v652_v46 = vpop.f32.mrf.mxu0 }
 0x40e   :  { %v654_v26 = vpop.f32.mrf.mxu0 }
 0x40f   :  { %v672_v56 = vpack.c.bf16 %v654_v26, %v652_v46 }
 0x416   :  { %v657_v47 = vpop.f32.mrf.mxu0 }
 0x41e   :  { %v659_v49 = vpop.f32.mrf.mxu0 }
 0x41f   :  { %v673_v55 = vpack.c.bf16 %v659_v49, %v657_v47 }
 0x426   :  { %v662_v52 = vpop.f32.mrf.mxu0 }
 0x42e   :  { %v664_v53 = vpop.f32.mrf.mxu0 }
 0x42f   :  { %v674_v54 = vpack.c.bf16 %v664_v53, %v662_v52 }
 0x431   :  { %678 = vmatpush.bf16.msrb.mxu1 %v674_v54 }
 0x435   :  { %679 = vmatpush.bf16.msrb.mxu1 %v673_v55 }
 0x439   :  { %680 = vmatpush.bf16.msrb.mxu1 %v672_v56 }
 0x43d   :  { %681 = vmatpush.bf16.msrb.mxu1 %v671_v58 }
 0x441   :  { %682 = vmatpush.bf16.msrb.mxu1 %v670_v38 }
 0x445   :  { %683 = vmatpush.bf16.msrb.mxu1 %v669_v35 }
 0x449   :  { %684 = vmatpush.bf16.msrb.mxu1 %v668_v32 }
 0x44d   :  { %685 = vmatpush.bf16.msrb.mxu1 %v667_v29 }
 0x450   :  { %686 = vmatmul.bf16.vlgmr.msrb.gmra.mxu1 %v1321_v40  ;;  %v1441_v40 = vld [vmem:[%s1703_s7] ss:$0 sm:$0xff] }
 0x460   :  { %691 = vmatmul.bf16.gmra.mxu1 %v1327_v41 }
 0x470   :  { %696 = vmatmul.bf16.gmra.mxu1 %v1339_v43 }
 0x480   :  { %701 = vmatmul.bf16.gmra.mxu1 %v1360_v48 }
 0x490   :  { %706 = vmatmul.bf16.gmra.mxu1 %v1333_v42 }
 0x4a0   :  { %711 = vmatmul.bf16.gmra.mxu1 %v1344_v44 }
 0x4b0   :  { %716 = vmatmul.bf16.gmra.mxu1 %v1368_v50 }
 0x4c0   :  { %721 = vmatmul.bf16.gmra.mxu1 %v1375_v51 }
 0x4cd   :  { %v687_v41 = vpop.f32.mrf.mxu1 }
 0x4ce   :  { %v688_v43 = vadd.f32 %v1441_v40, %v687_v41 }
 0x4d0   :  { %v730_v42 = vsel %vm729_vm0, %v688_v43, -1e+30 }
 0x4d1   :  { %746 = vmax.xlane.f32.xlu0 %v730_v42 }
 0x4d5   :  { %v689_v44 = vpop.f32.mrf.mxu1 }
 0x4d6   :  { %v690_v48 = vadd.f32 %v1441_v40, %v689_v44 }
 0x4d8   :  { %v1450_v50 = vsel %vm729_vm0, %v690_v48, -1e+30 }
 0x4d9   :  { %748 = vmax.xlane.f32.xlu0 %v1450_v50 }
 0x4dd   :  { %v692_v51 = vpop.f32.mrf.mxu1 }
 0x4de   :  { %v693_v61 = vadd.f32 %v1441_v40, %v692_v51 }
 0x4e0   :  { %v1456_v62 = vsel %vm729_vm0, %v693_v61, -1e+30 }
 0x4e1   :  { %750 = vmax.xlane.f32.xlu1 %v1456_v62 }
 0x4e5   :  { %v694_v63 = vpop.f32.mrf.mxu1 }
 0x4e6   :  { %v695_v0 = vadd.f32 %v1441_v40, %v694_v63 }
 0x4e8   :  { %v1462_v1 = vsel %vm729_vm0, %v695_v0, -1e+30 }
 0x4e9   :  { %752 = vmax.xlane.f32.xlu1 %v1462_v1 }
 0x4ed   :  { %v697_v2 = vpop.f32.mrf.mxu1 }
 0x4ee   :  { %v698_v3 = vadd.f32 %v1441_v40, %v697_v2 }
 0x4f0   :  { %v1468_v4 = vsel %vm729_vm0, %v698_v3, -1e+30 }
 0x4f1   :  { %754 = vmax.xlane.f32.xlu2 %v1468_v4 }
 0x4f5   :  { %v699_v5 = vpop.f32.mrf.mxu1 }
 0x4f6   :  { %v700_v6 = vadd.f32 %v1441_v40, %v699_v5 }
 0x4f8   :  { %v1474_v7 = vsel %vm729_vm0, %v700_v6, -1e+30 }
 0x4f9   :  { %756 = vmax.xlane.f32.xlu2 %v1474_v7 }
 0x4fd   :  { %v702_v8 = vpop.f32.mrf.mxu1 }
 0x4fe   :  { %v703_v57 = vadd.f32 %v1441_v40, %v702_v8 }
 0x500   :  { %v1480_v9 = vsel %vm729_vm0, %v703_v57, -1e+30 }
 0x501   :  { %758 = vmax.xlane.f32.xlu0 %v1480_v9 }
 0x505   :  { %v704_v10 = vpop.f32.mrf.mxu1 }
 0x506   :  { %v705_v11 = vadd.f32 %v1441_v40, %v704_v10 }
 0x508   :  { %v1486_v12 = vsel %vm729_vm0, %v705_v11, -1e+30 }
 0x509   :  { %760 = vmax.xlane.f32.xlu1 %v1486_v12 }
 0x50d   :  { %v707_v13 = vpop.f32.mrf.mxu1 }
 0x50e   :  { %v708_v14 = vadd.f32 %v1441_v40, %v707_v13 }
 0x510   :  { %v1492_v15 = vsel %vm729_vm0, %v708_v14, -1e+30 }
 0x511   :  { %762 = vmax.xlane.f32.xlu2 %v1492_v15 }
 0x515   :  { %v709_v16 = vpop.f32.mrf.mxu1 }
 0x516   :  { %v710_v17 = vadd.f32 %v1441_v40, %v709_v16 }
 0x518   :  { %v1498_v18 = vsel %vm729_vm0, %v710_v17, -1e+30 }
 0x519   :  { %764 = vmax.xlane.f32.xlu0 %v1498_v18 }
 0x51d   :  { %v712_v19 = vpop.f32.mrf.mxu1 }
 0x51e   :  { %v713_v20 = vadd.f32 %v1441_v40, %v712_v19 }
 0x520   :  { %v1504_v21 = vsel %vm729_vm0, %v713_v20, -1e+30 }
 0x521   :  { %766 = vmax.xlane.f32.xlu1 %v1504_v21 }
 0x525   :  { %v714_v22 = vpop.f32.mrf.mxu1 }
 0x526   :  { %v715_v23 = vadd.f32 %v1441_v40, %v714_v22 }
 0x528   :  { %v1510_v24 = vsel %vm729_vm0, %v715_v23, -1e+30 }
 0x529   :  { %768 = vmax.xlane.f32.xlu2 %v1510_v24 }
 0x52d   :  { %v717_v25 = vpop.f32.mrf.mxu1 }
 0x52e   :  { %v718_v27 = vadd.f32 %v1441_v40, %v717_v25 }
 0x530   :  { %v1516_v28 = vsel %vm729_vm0, %v718_v27, -1e+30 }
 0x531   :  { %770 = vmax.xlane.f32.xlu0 %v1516_v28 }
 0x535   :  { %v719_v29 = vpop.f32.mrf.mxu1 }
 0x536   :  { %v720_v30 = vadd.f32 %v1441_v40, %v719_v29 }
 0x538   :  { %v1522_v31 = vsel %vm729_vm0, %v720_v30, -1e+30 }
 0x539   :  { %772 = vmax.xlane.f32.xlu1 %v1522_v31 }
 0x53d   :  { %v722_v32 = vpop.f32.mrf.mxu1 }
 0x53e   :  { %v723_v33 = vadd.f32 %v1441_v40, %v722_v32 }
 0x540   :  { %v1528_v34 = vsel %vm729_vm0, %v723_v33, -1e+30 }
 0x541   :  { %774 = vmax.xlane.f32.xlu2 %v1528_v34 }
 0x544   :  { %v747_v35 = vpop.xlane.xlu0 %746 }
 0x545   :  { %v1531_v36 = vsub.f32 %v730_v42, %v747_v35  ;;  %v724_v37 = vpop.f32.mrf.mxu1 }
 0x546   :  { %v725_v38 = vadd.f32 %v1441_v40, %v724_v37 }
 0x547   :  { %v794_v39 = vmul.f32 1.442695, %v1531_v36 }
 0x548   :  { %v1537_v45 = vsel %vm729_vm0, %v725_v38, -1e+30 }
 0x549   :  { %1161 = vpow2.f32 %v794_v39  ;;  %776 = vmax.xlane.f32.xlu0 %v1537_v45 }
 0x54c   :  { %v749_v46 = vpop.xlane.xlu0 %748 }
 0x54d   :  { %v1541_v26 = vsub.f32 %v1450_v50, %v749_v46 }
 0x54f   :  { %v1162_v47 = vpop.eup %1161  ;;  %v796_v49 = vmul.f32 1.442695, %v1541_v26 }
 0x550   :  { %v826_v52 = vsel %vm729_vm0, %v1162_v47, 0.0 }
 0x551   :  { %1163 = vpow2.f32 %v796_v49  ;;  %842 = vadd.xlane.f32.xlu1 %v826_v52 }
 0x554   :  { %v751_v53 = vpop.xlane.xlu1 %750 }
 0x555   :  { %v1547_v54 = vsub.f32 %v1456_v62, %v751_v53 }
 0x557   :  { %v1164_v55 = vpop.eup %1163  ;;  %v798_v56 = vmul.f32 1.442695, %v1547_v54 }
 0x558   :  { %v827_v58 = vsel %vm729_vm0, %v1164_v55, 0.0 }
 0x559   :  { %1165 = vpow2.f32 %v798_v56  ;;  %844 = vadd.xlane.f32.xlu2 %v827_v58 }
 0x55c   :  { %v753_v59 = vpop.xlane.xlu1 %752 }
 0x55d   :  { %v1553_v40 = vsub.f32 %v1462_v1, %v753_v59 }
 0x55f   :  { %v1166_v41 = vpop.eup %1165  ;;  %v800_v43 = vmul.f32 1.442695, %v1553_v40 }
 0x560   :  { %v828_v42 = vsel %vm729_vm0, %v1166_v41, 0.0 }
 0x561   :  { %1167 = vpow2.f32 %v800_v43  ;;  %846 = vadd.xlane.f32.xlu0 %v828_v42 }
 0x564   :  { %v755_v44 = vpop.xlane.xlu2 %754 }
 0x565   :  { %v1559_v48 = vsub.f32 %v1468_v4, %v755_v44 }
 0x567   :  { %v1168_v50 = vpop.eup %1167  ;;  %v802_v51 = vmul.f32 1.442695, %v1559_v48 }
 0x568   :  { %v829_v61 = vsel %vm729_vm0, %v1168_v50, 0.0 }
 0x569   :  { %1169 = vpow2.f32 %v802_v51  ;;  %848 = vadd.xlane.f32.xlu1 %v829_v61 }
 0x56c   :  { %v757_v62 = vpop.xlane.xlu2 %756 }
 0x56d   :  { %v1565_v63 = vsub.f32 %v1474_v7, %v757_v62 }
 0x56f   :  { %v1170_v0 = vpop.eup %1169  ;;  %v804_v1 = vmul.f32 1.442695, %v1565_v63 }
 0x570   :  { %v830_v2 = vsel %vm729_vm0, %v1170_v0, 0.0 }
 0x571   :  { %1171 = vpow2.f32 %v804_v1  ;;  %850 = vadd.xlane.f32.xlu2 %v830_v2 }
 0x574   :  { %v759_v3 = vpop.xlane.xlu0 %758 }
 0x575   :  { %v1571_v4 = vsub.f32 %v1480_v9, %v759_v3 }
 0x577   :  { %v1172_v5 = vpop.eup %1171  ;;  %v806_v6 = vmul.f32 1.442695, %v1571_v4 }
 0x578   :  { %v831_v8 = vsel %vm729_vm0, %v1172_v5, 0.0 }
 0x579   :  { %1173 = vpow2.f32 %v806_v6  ;;  %852 = vadd.xlane.f32.xlu0 %v831_v8 }
 0x57c   :  { %v761_v7 = vpop.xlane.xlu1 %760 }
 0x57d   :  { %v1577_v57 = vsub.f32 %v1486_v12, %v761_v7 }
 0x57f   :  { %v1174_v10 = vpop.eup %1173  ;;  %v808_v11 = vmul.f32 1.442695, %v1577_v57 }
 0x580   :  { %v832_v13 = vsel %vm729_vm0, %v1174_v10, 0.0 }
 0x581   :  { %1175 = vpow2.f32 %v808_v11  ;;  %854 = vadd.xlane.f32.xlu1 %v832_v13 }
 0x584   :  { %v763_v9 = vpop.xlane.xlu2 %762 }
 0x585   :  { %v1583_v14 = vsub.f32 %v1492_v15, %v763_v9 }
 0x587   :  { %v1176_v16 = vpop.eup %1175  ;;  %v810_v17 = vmul.f32 1.442695, %v1583_v14 }
 0x588   :  { %v833_v19 = vsel %vm729_vm0, %v1176_v16, 0.0 }
 0x589   :  { %1177 = vpow2.f32 %v810_v17  ;;  %856 = vadd.xlane.f32.xlu2 %v833_v19 }
 0x58c   :  { %v765_v12 = vpop.xlane.xlu0 %764 }
 0x58d   :  { %v1589_v20 = vsub.f32 %v1498_v18, %v765_v12 }
 0x58f   :  { %v1178_v22 = vpop.eup %1177  ;;  %v812_v23 = vmul.f32 1.442695, %v1589_v20 }
 0x590   :  { %v834_v25 = vsel %vm729_vm0, %v1178_v22, 0.0 }
 0x591   :  { %1179 = vpow2.f32 %v812_v23  ;;  %858 = vadd.xlane.f32.xlu0 %v834_v25 }
 0x594   :  { %v767_v15 = vpop.xlane.xlu1 %766 }
 0x595   :  { %v1595_v27 = vsub.f32 %v1504_v21, %v767_v15 }
 0x597   :  { %v1180_v29 = vpop.eup %1179  ;;  %v814_v30 = vmul.f32 1.442695, %v1595_v27 }
 0x598   :  { %v835_v32 = vsel %vm729_vm0, %v1180_v29, 0.0 }
 0x599   :  { %1181 = vpow2.f32 %v814_v30  ;;  %860 = vadd.xlane.f32.xlu1 %v835_v32 }
 0x59c   :  { %v769_v18 = vpop.xlane.xlu2 %768 }
 0x59d   :  { %v1601_v33 = vsub.f32 %v1510_v24, %v769_v18 }
 0x59f   :  { %v1182_v35 = vpop.eup %1181  ;;  %v816_v37 = vmul.f32 1.442695, %v1601_v33 }
 0x5a0   :  { %v836_v38 = vsel %vm729_vm0, %v1182_v35, 0.0 }
 0x5a1   :  { %1183 = vpow2.f32 %v816_v37  ;;  %862 = vadd.xlane.f32.xlu2 %v836_v38 }
 0x5a4   :  { %v771_v21 = vpop.xlane.xlu0 %770 }
 0x5a5   :  { %v1607_v39 = vsub.f32 %v1516_v28, %v771_v21 }
 0x5a7   :  { %v1184_v46 = vpop.eup %1183  ;;  %v818_v47 = vmul.f32 1.442695, %v1607_v39 }
 0x5a8   :  { %v837_v49 = vsel %vm729_vm0, %v1184_v46, 0.0 }
 0x5a9   :  { %1185 = vpow2.f32 %v818_v47  ;;  %864 = vadd.xlane.f32.xlu0 %v837_v49 }
 0x5ac   :  { %v773_v24 = vpop.xlane.xlu1 %772 }
 0x5ad   :  { %v1613_v52 = vsub.f32 %v1522_v31, %v773_v24 }
 0x5af   :  { %v1186_v53 = vpop.eup %1185  ;;  %v820_v55 = vmul.f32 1.442695, %v1613_v52 }
 0x5b0   :  { %v838_v56 = vsel %vm729_vm0, %v1186_v53, 0.0 }
 0x5b1   :  { %1187 = vpow2.f32 %v820_v55  ;;  %866 = vadd.xlane.f32.xlu1 %v838_v56 }
 0x5b4   :  { %v775_v28 = vpop.xlane.xlu2 %774 }
 0x5b5   :  { %v1619_v58 = vsub.f32 %v1528_v34, %v775_v28 }
 0x5b7   :  { %v1188_v59 = vpop.eup %1187  ;;  %v822_v41 = vmul.f32 1.442695, %v1619_v58 }
 0x5b8   :  { %v839_v43 = vsel %vm729_vm0, %v1188_v59, 0.0 }
 0x5b9   :  { %1189 = vpow2.f32 %v822_v41  ;;  %868 = vadd.xlane.f32.xlu2 %v839_v43 }
 0x5bc   :  { %v777_v31 = vpop.xlane.xlu0 %776 }
 0x5bd   :  { %v1625_v42 = vsub.f32 %v1537_v45, %v777_v31 }
 0x5bf   :  { %v1190_v44 = vpop.eup %1189  ;;  %v824_v50 = vmul.f32 1.442695, %v1625_v42 }
 0x5c0   :  { %v840_v51 = vsel %vm729_vm0, %v1190_v44, 0.0 }
 0x5c1   :  { %1191 = vpow2.f32 %v824_v50  ;;  %870 = vadd.xlane.f32.xlu0 %v840_v51 }
 0x5c4   :  { %v843_v34 = vpop.xlane.xlu1 %842 }
 0x5c5   :  { %1193 = vlog2.f32 %v843_v34 }
 0x5c7   :  { %v1192_v61 = vpop.eup %1191 }
 0x5c8   :  { %v841_v62 = vsel %vm729_vm0, %v1192_v61, 0.0 }
 0x5c9   :  { %872 = vadd.xlane.f32.xlu1 %v841_v62 }
 0x5cb   :  { %v1194_v0 = vpop.eup %1193 }
 0x5cc   :  { %v875_v1 = vmul.f32 0.6931472, %v1194_v0  ;;  %v845_v2 = vpop.xlane.xlu2 %844 }
 0x5cd   :  { %1195 = vlog2.f32 %v845_v2 }
 0x5ce   :  { %v906_v45 = vsub.f32 %v1531_v36, %v875_v1 }
 0x5d0   :  { %922 = vst [vmem:[%s1704_s8] sm:$0xff] %v906_v45 }
 0x5d3   :  { %v1196_v3 = vpop.eup %1195 }
 0x5d4   :  { %v877_v5 = vmul.f32 0.6931472, %v1196_v3  ;;  %v847_v6 = vpop.xlane.xlu0 %846 }
 0x5d5   :  { %1197 = vlog2.f32 %v847_v6 }
 0x5d6   :  { %v907_v8 = vsub.f32 %v1541_v26, %v877_v5 }
 0x5d8   :  { %923 = vst [vmem:[%s1704_s8 + $0x8] sm:$0xff] %v907_v8 }
 0x5db   :  { %v1198_v60 = vpop.eup %1197 }
 0x5dc   :  { %v879_v7 = vmul.f32 0.6931472, %v1198_v60  ;;  %v849_v10 = vpop.xlane.xlu1 %848 }
 0x5dd   :  { %1199 = vlog2.f32 %v849_v10 }
 0x5de   :  { %v908_v36 = vsub.f32 %v1547_v54, %v879_v7 }
 0x5e0   :  { %924 = vst [vmem:[%s1704_s8 + $0x10] sm:$0xff] %v908_v36 }
 0x5e3   :  { %v1200_v11 = vpop.eup %1199 }
 0x5e4   :  { %v881_v13 = vmul.f32 0.6931472, %v1200_v11  ;;  %v851_v9 = vpop.xlane.xlu2 %850 }
 0x5e5   :  { %1201 = vlog2.f32 %v851_v9 }
 0x5e6   :  { %v909_v26 = vsub.f32 %v1553_v40, %v881_v13 }
 0x5e8   :  { %925 = vst [vmem:[%s1704_s8 + $0x18] sm:$0xff] %v909_v26 }
 0x5eb   :  { %v1202_v16 = vpop.eup %1201 }
 0x5ec   :  { %v883_v17 = vmul.f32 0.6931472, %v1202_v16  ;;  %v853_v19 = vpop.xlane.xlu0 %852 }
 0x5ed   :  { %1203 = vlog2.f32 %v853_v19 }
 0x5ee   :  { %v910_v54 = vsub.f32 %v1559_v48, %v883_v17 }
 0x5f0   :  { %926 = vst [vmem:[%s1704_s8 + $0x20] sm:$0xff] %v910_v54 }
 0x5f3   :  { %v1204_v12 = vpop.eup %1203 }
 0x5f4   :  { %v885_v22 = vmul.f32 0.6931472, %v1204_v12  ;;  %v855_v23 = vpop.xlane.xlu1 %854 }
 0x5f5   :  { %1205 = vlog2.f32 %v855_v23 }
 0x5f6   :  { %v911_v40 = vsub.f32 %v1565_v63, %v885_v22 }
 0x5f8   :  { %927 = vst [vmem:[%s1704_s8 + $0x28] sm:$0xff] %v911_v40 }
 0x5fb   :  { %v1206_v25 = vpop.eup %1205 }
 0x5fc   :  { %v887_v15 = vmul.f32 0.6931472, %v1206_v25  ;;  %v857_v29 = vpop.xlane.xlu2 %856 }
 0x5fd   :  { %1207 = vlog2.f32 %v857_v29 }
 0x5fe   :  { %v912_v48 = vsub.f32 %v1571_v4, %v887_v15 }
 0x600   :  { %928 = vst [vmem:[%s1704_s8 + $0x30] sm:$0xff] %v912_v48 }
 0x603   :  { %v1208_v30 = vpop.eup %1207 }
 0x604   :  { %v889_v32 = vmul.f32 0.6931472, %v1208_v30  ;;  %v859_v18 = vpop.xlane.xlu0 %858 }
 0x605   :  { %1209 = vlog2.f32 %v859_v18 }
 0x606   :  { %v913_v63 = vsub.f32 %v1577_v57, %v889_v32 }
 0x608   :  { %929 = vst [vmem:[%s1704_s8 + $0x38] sm:$0xff] %v913_v63 }
 0x60b   :  { %v1210_v35 = vpop.eup %1209 }
 0x60c   :  { %v891_v37 = vmul.f32 0.6931472, %v1210_v35  ;;  %v861_v38 = vpop.xlane.xlu1 %860 }
 0x60d   :  { %1211 = vlog2.f32 %v861_v38 }
 0x60e   :  { %v914_v4 = vsub.f32 %v1583_v14, %v891_v37 }
 0x610   :  { %930 = vst [vmem:[%s1704_s8 + $0x40] sm:$0xff] %v914_v4 }
 0x613   :  { %v1212_v21 = vpop.eup %1211 }
 0x614   :  { %v893_v46 = vmul.f32 0.6931472, %v1212_v21  ;;  %v863_v47 = vpop.xlane.xlu2 %862 }
 0x615   :  { %1213 = vlog2.f32 %v863_v47 }
 0x616   :  { %v915_v57 = vsub.f32 %v1589_v20, %v893_v46 }
 0x618   :  { %931 = vst [vmem:[%s1704_s8 + $0x48] sm:$0xff] %v915_v57 }
 0x61b   :  { %v1214_v49 = vpop.eup %1213 }
 0x61c   :  { %v895_v24 = vmul.f32 0.6931472, %v1214_v49  ;;  %v865_v53 = vpop.xlane.xlu0 %864 }
 0x61d   :  { %1215 = vlog2.f32 %v865_v53 }
 0x61e   :  { %v916_v14 = vsub.f32 %v1595_v27, %v895_v24 }
 0x620   :  { %932 = vst [vmem:[%s1704_s8 + $0x50] sm:$0xff] %v916_v14 }
 0x623   :  { %v1216_v55 = vpop.eup %1215 }
 0x624   :  { %v897_v56 = vmul.f32 0.6931472, %v1216_v55  ;;  %v867_v28 = vpop.xlane.xlu1 %866 }
 0x625   :  { %1217 = vlog2.f32 %v867_v28 }
 0x626   :  { %v917_v20 = vsub.f32 %v1601_v33, %v897_v56 }
 0x628   :  { %933 = vst [vmem:[%s1704_s8 + $0x58] sm:$0xff] %v917_v20 }
 0x62b   :  { %v1218_v59 = vpop.eup %1217 }
 0x62c   :  { %v899_v41 = vmul.f32 0.6931472, %v1218_v59  ;;  %v869_v43 = vpop.xlane.xlu2 %868 }
 0x62d   :  { %1219 = vlog2.f32 %v869_v43 }
 0x62e   :  { %v918_v27 = vsub.f32 %v1607_v39, %v899_v41 }
 0x630   :  { %934 = vst [vmem:[%s1704_s8 + $0x60] sm:$0xff] %v918_v27 }
 0x633   :  { %v1220_v31 = vpop.eup %1219 }
 0x634   :  { %v901_v44 = vmul.f32 0.6931472, %v1220_v31  ;;  %v871_v50 = vpop.xlane.xlu0 %870 }
 0x635   :  { %1221 = vlog2.f32 %v871_v50 }
 0x636   :  { %v919_v33 = vsub.f32 %v1613_v52, %v901_v44 }
 0x638   :  { %935 = vst [vmem:[%s1704_s8 + $0x68] sm:$0xff] %v919_v33 }
 0x63b   :  { %v1222_v51 = vpop.eup %1221 }
 0x63c   :  { %v903_v34 = vmul.f32 0.6931472, %v1222_v51  ;;  %v873_v61 = vpop.xlane.xlu1 %872 }
 0x63d   :  { %1223 = vlog2.f32 %v873_v61 }
 0x63e   :  { %v920_v39 = vsub.f32 %v1619_v58, %v903_v34 }
 0x640   :  { %936 = vst [vmem:[%s1704_s8 + $0x70] sm:$0xff] %v920_v39 }
 0x643   :  { %v1224_v62 = vpop.eup %1223 }
 0x644   :  { %v905_v0 = vmul.f32 0.6931472, %v1224_v62 }
 0x646   :  { %v921_v1 = vsub.f32 %v1625_v42, %v905_v0 }
 0x648   :  { %937 = vst [vmem:[%s1704_s8 + $0x78] sm:$0xff] %v921_v1 }

</bundles_post_ra>
